<compile_context>
chip_gen: v7x
topology: tpu7x:2x2x1
jax: 0.10.0
libtpu: 0.0.40
codegen_flags: <defaults>
</compile_context>

<pallas_src>
import jax
import jax.numpy as jnp
from jax.experimental import pallas as pl
from jax.experimental.pallas import tpu as pltpu

_INV_SQRT2 = 0.7071067811865476
_LN_EPS = 1e-5
_VMEM_LIMIT_CACHE = None


# ---------------------------- helpers ----------------------------

def _vmem_limit_bytes():
    """~75% of physical VMEM, capped at 96 MiB (v5e/v6e: 96 MiB, v7x: 48 MiB)."""
    global _VMEM_LIMIT_CACHE
    if _VMEM_LIMIT_CACHE is None:
        cap = None
        try:
            cap = getattr(pltpu.get_tpu_info(), "vmem_capacity_bytes", None)
        except Exception:
            cap = None
        if not cap or cap < (32 << 20):
            cap = 64 << 20                      # conservative (v7x-safe) default
        _VMEM_LIMIT_CACHE = int(min(96 << 20, (cap * 3) // 4))
    return _VMEM_LIMIT_CACHE


def _pick_tile(dim, target, quantum):
    """Largest tile <= target that divides dim and is a multiple of `quantum`,
    falling back to the full dimension (always a legal TPU block size)."""
    if dim <= target:
        return dim
    t = (target // quantum) * quantum
    while t >= quantum:
        if dim % t == 0:
            return t
        t -= quantum
    return dim


def _layernorm_f32(x, g, b):
    mu = jnp.mean(x, axis=-1, keepdims=True)
    var = jnp.mean((x - mu) ** 2, axis=-1, keepdims=True)   # biased, like nn.LayerNorm
    return ((x - mu) * jax.lax.rsqrt(var + _LN_EPS)) * g + b


# ---------------------------- kernels ----------------------------

def _make_ln_qkv_kernel(n_out, heads):
    """Fused LayerNorm + n_out bias-free projections, emitting head-major output.
    LN is computed once per row tile (no column grid axis)."""
    def kernel(x_ref, g_ref, b_ref, *rest):
        w_refs, o_refs = rest[:n_out], rest[n_out:]
        xn = _layernorm_f32(x_ref[0], g_ref[...], b_ref[...]).astype(jnp.bfloat16)
        for w_ref, o_ref in zip(w_refs, o_refs):
            for h in range(heads):                       # static unroll
                o_ref[h, 0] = jnp.dot(
                    xn, w_ref[h], preferred_element_type=jnp.float32).astype(o_ref.dtype)
    return kernel


def _make_qkv_kernel(n_out, heads):
    """n_out bias-free projections of an un-normalized input, head-major output."""
    def kernel(x_ref, *rest):
        w_refs, o_refs = rest[:n_out], rest[n_out:]
        xb = x_ref[0].astype(jnp.bfloat16)
        for w_ref, o_ref in zip(w_refs, o_refs):
            for h in range(heads):
                o_ref[h, 0] = jnp.dot(
                    xb, w_ref[h], preferred_element_type=jnp.float32).astype(o_ref.dtype)
    return kernel


def _flash_wo_kernel(q_ref, k_ref, v_ref, wo_ref, bo_ref, res_ref, o_ref,
                     m_ref, l_ref, acc_ref, oacc_ref):
    """Head-major flash attention with online softmax, fused with the attention
    output projection (per-head Wo slice), bias, and residual add.
    Grid: (batch, q_tile, head, kv_tile); head/kv axes are reductions."""
    h = pl.program_id(2)
    ki = pl.program_id(3)
    nh = pl.num_programs(2)
    nk = pl.num_programs(3)

    @pl.when(jnp.logical_and(h == 0, ki == 0))
    def _():
        oacc_ref[...] = jnp.zeros(oacc_ref.shape, jnp.float32)

    @pl.when(ki == 0)
    def _():
        m_ref[...] = jnp.full(m_ref.shape, -jnp.inf, jnp.float32)
        l_ref[...] = jnp.zeros(l_ref.shape, jnp.float32)
        acc_ref[...] = jnp.zeros(acc_ref.shape, jnp.float32)

    q = q_ref[0, 0]                       # (tq,  hd) bf16 (softmax scale folded into Wq)
    k = k_ref[0, 0]                       # (tkv, hd) bf16
    v = v_ref[0, 0]                       # (tkv, hd) bf16
    # Contract last dims directly -> no explicit transpose of K.
    s = jax.lax.dot_general(q, k, (((1,), (1,)), ((), ())),
                            preferred_element_type=jnp.float32)          # (tq, tkv)
    m_prev = m_ref[...]                                                   # (tq, 1)
    m_new = jnp.maximum(m_prev, jnp.max(s, axis=-1, keepdims=True))
    alpha = jnp.exp(m_prev - m_new)
    # NOTE: exp kept f32 (EUP-bound regime for hd<=64, but v5e EUP has no bf16 path).
    p = jnp.exp(s - m_new)
    l_ref[...] = alpha * l_ref[...] + jnp.sum(p, axis=-1, keepdims=True)
    acc_ref[...] = alpha * acc_ref[...] + jnp.dot(
        p.astype(jnp.bfloat16), v, preferred_element_type=jnp.float32)
    m_ref[...] = m_new

    @pl.when(ki == nk - 1)
    def _():
        # Finalize this head and fold its contribution into the output projection.
        o_h = acc_ref[...] * pl.reciprocal(l_ref[...], approx=True)       # (tq, hd) f32
        oacc_ref[...] += jnp.dot(o_h.astype(jnp.bfloat16), wo_ref[0],
                                 preferred_element_type=jnp.float32)      # (tq, D)

    @pl.when(jnp.logical_and(h == nh - 1, ki == nk - 1))
    def _():
        o_ref[0] = (oacc_ref[...] + bo_ref[...] + res_ref[0]).astype(o_ref.dtype)


def _ff_fused_kernel(x_ref, g_ref, b_ref, wa_ref, ba_ref, wg_ref, bg_ref,
                     w2_ref, b2_ref, o_ref, xn_ref, acc_ref):
    """Fused LayerNorm + GEGLU (value/gate proj + erf-GELU gating) + W2 down-projection
    + bias + residual. Grid: (row_tile, ff_hidden_chunk); the GEGLU intermediate never
    leaves VMEM and LN is computed once per row tile."""
    c = pl.program_id(1)

    @pl.when(c == 0)
    def _():
        xn_ref[...] = _layernorm_f32(x_ref[...], g_ref[...], b_ref[...]).astype(jnp.bfloat16)
        acc_ref[...] = jnp.zeros(acc_ref.shape, jnp.float32)

    xn = xn_ref[...]
    a = jnp.dot(xn, wa_ref[...], preferred_element_type=jnp.float32) + ba_ref[...]
    gt = jnp.dot(xn, wg_ref[...], preferred_element_type=jnp.float32) + bg_ref[...]
    hchunk = a * (0.5 * gt * (1.0 + jax.lax.erf(gt * _INV_SQRT2)))        # (tr, tcf)
    acc_ref[...] += jnp.dot(hchunk.astype(jnp.bfloat16), w2_ref[...],
                            preferred_element_type=jnp.float32)           # (tr, D)

    @pl.when(c == pl.num_programs(1) - 1)
    def _():
        o_ref[...] = (acc_ref[...] + b2_ref[...] + x_ref[...]).astype(o_ref.dtype)


# ---------------------------- wrappers ----------------------------

def ln_qkv_proj(x, gamma, beta, weights, *, heads, head_dim, row_tile=512):
    """LN(x) @ W for each W, emitting (heads, B, N, head_dim) bf16 per output."""
    B, N, D = x.shape
    n_out = len(weights)
    tr = _pick_tile(N, row_tile, 16)
    grid = (B, N // tr)
    in_specs = ([pl.BlockSpec((1, tr, D), lambda b, i: (b, i, 0)),
                 pl.BlockSpec((1, D), lambda b, i: (0, 0)),
                 pl.BlockSpec((1, D), lambda b, i: (0, 0))]
                + [pl.BlockSpec((heads, D, head_dim), lambda b, i: (0, 0, 0))
                   for _ in range(n_out)])
    out_specs = [pl.BlockSpec((heads, 1, tr, head_dim), lambda b, i: (0, b, i, 0))
                 for _ in range(n_out)]
    out_shape = [jax.ShapeDtypeStruct((heads, B, N, head_dim), jnp.bfloat16)
                 for _ in range(n_out)]
    return pl.pallas_call(
        _make_ln_qkv_kernel(n_out, heads),
        grid=grid, in_specs=in_specs, out_specs=out_specs, out_shape=out_shape,
        compiler_params=pltpu.CompilerParams(
            dimension_semantics=("parallel", "parallel"),
            vmem_limit_bytes=_vmem_limit_bytes()),
    )(x, gamma.reshape(1, D), beta.reshape(1, D), *weights)


def qkv_proj(x, weights, *, heads, head_dim, row_tile=512):
    """x @ W for each W (no LayerNorm), emitting (heads, B, M, head_dim) bf16."""
    B, M, D = x.shape
    n_out = len(weights)
    tr = _pick_tile(M, row_tile, 16)
    grid = (B, M // tr)
    in_specs = ([pl.BlockSpec((1, tr, D), lambda b, i: (b, i, 0))]
                + [pl.BlockSpec((heads, D, head_dim), lambda b, i: (0, 0, 0))
                   for _ in range(n_out)])
    out_specs = [pl.BlockSpec((heads, 1, tr, head_dim), lambda b, i: (0, b, i, 0))
                 for _ in range(n_out)]
    out_shape = [jax.ShapeDtypeStruct((heads, B, M, head_dim), jnp.bfloat16)
                 for _ in range(n_out)]
    return pl.pallas_call(
        _make_qkv_kernel(n_out, heads),
        grid=grid, in_specs=in_specs, out_specs=out_specs, out_shape=out_shape,
        compiler_params=pltpu.CompilerParams(
            dimension_semantics=("parallel", "parallel"),
            vmem_limit_bytes=_vmem_limit_bytes()),
    )(x, *weights)


def flash_attention_out(q, k, v, wo, bo, x_res, *, q_tile=256, kv_tile=512):
    """softmax(Q K^T) V  (online softmax, head-major) fused with Wo + bias + residual."""
    H, B, Nq, hd = q.shape
    Nk = k.shape[2]
    D = wo.shape[2]
    tq = _pick_tile(Nq, q_tile, 16)
    tkv = _pick_tile(Nk, kv_tile, 16)
    grid = (B, Nq // tq, H, Nk // tkv)
    return pl.pallas_call(
        _flash_wo_kernel,
        grid=grid,
        in_specs=[pl.BlockSpec((1, 1, tq, hd), lambda b, qi, h, ki: (h, b, qi, 0)),
                  pl.BlockSpec((1, 1, tkv, hd), lambda b, qi, h, ki: (h, b, ki, 0)),
                  pl.BlockSpec((1, 1, tkv, hd), lambda b, qi, h, ki: (h, b, ki, 0)),
                  pl.BlockSpec((1, hd, D), lambda b, qi, h, ki: (h, 0, 0)),
                  pl.BlockSpec((1, D), lambda b, qi, h, ki: (0, 0)),
                  pl.BlockSpec((1, tq, D), lambda b, qi, h, ki: (b, qi, 0))],
        out_specs=pl.BlockSpec((1, tq, D), lambda b, qi, h, ki: (b, qi, 0)),
        out_shape=jax.ShapeDtypeStruct((B, Nq, D), jnp.float32),
        scratch_shapes=[pltpu.VMEM((tq, 1), jnp.float32),     # m
                        pltpu.VMEM((tq, 1), jnp.float32),     # l
                        pltpu.VMEM((tq, hd), jnp.float32),    # per-head acc
                        pltpu.VMEM((tq, D), jnp.float32)],    # fused-Wo output acc
        compiler_params=pltpu.CompilerParams(
            dimension_semantics=("parallel", "parallel", "arbitrary", "arbitrary"),
            vmem_limit_bytes=_vmem_limit_bytes()),
    )(q, k, v, wo, bo, x_res)


def ff_fused(x2d, gamma, beta, p, *, row_tile=512, ff_tile=512):
    """y = W2 @ GEGLU(LN(x)) + b2 + x, fully fused (K-reduction over ff_hidden)."""
    R, D = x2d.shape
    FFH = p["wa"].shape[1]
    tr = _pick_tile(R, row_tile, 8)
    tcf = _pick_tile(FFH, ff_tile, 128)
    grid = (R // tr, FFH // tcf)
    return pl.pallas_call(
        _ff_fused_kernel,
        grid=grid,
        in_specs=[pl.BlockSpec((tr, D), lambda i, c: (i, 0)),     # x (LN input + residual)
                  pl.BlockSpec((1, D), lambda i, c: (0, 0)),
                  pl.BlockSpec((1, D), lambda i, c: (0, 0)),
                  pl.BlockSpec((D, tcf), lambda i, c: (0, c)),    # Wa
                  pl.BlockSpec((1, tcf), lambda i, c: (0, c)),    # ba
                  pl.BlockSpec((D, tcf), lambda i, c: (0, c)),    # Wg
                  pl.BlockSpec((1, tcf), lambda i, c: (0, c)),    # bg
                  pl.BlockSpec((tcf, D), lambda i, c: (c, 0)),    # W2
                  pl.BlockSpec((1, D), lambda i, c: (0, 0))],     # b2
        out_specs=pl.BlockSpec((tr, D), lambda i, c: (i, 0)),
        out_shape=jax.ShapeDtypeStruct((R, D), jnp.float32),
        scratch_shapes=[pltpu.VMEM((tr, D), jnp.bfloat16),        # xn (LN computed once)
                        pltpu.VMEM((tr, D), jnp.float32)],        # down-proj accumulator
        compiler_params=pltpu.CompilerParams(
            dimension_semantics=("parallel", "arbitrary"),
            vmem_limit_bytes=_vmem_limit_bytes()),
    )(x2d, gamma.reshape(1, D), beta.reshape(1, D),
      p["wa"], p["ba"], p["wg"], p["bg"], p["w2"], p["b2"])


# ---------------------------- module-level forward ----------------------------

def cross_attention_block(x, p, ln_g, ln_b, context=None):
    """y = CrossAttention(LayerNorm(x), context) + x   (LN, flash, Wo, residual fused)."""
    H, hd = p["heads"], p["head_dim"]
    if context is None:
        q, k, v = ln_qkv_proj(x, ln_g, ln_b, (p["wq"], p["wk"], p["wv"]),
                              heads=H, head_dim=hd)
    else:
        (q,) = ln_qkv_proj(x, ln_g, ln_b, (p["wq"],), heads=H, head_dim=hd)
        k, v = qkv_proj(context, (p["wk"], p["wv"]), heads=H, head_dim=hd)
    return flash_attention_out(q, k, v, p["wo"], p["bo"], x)


def feed_forward_block(x, p, ln_g, ln_b):
    """y = FeedForward(LayerNorm(x)) + x   (single fused kernel)."""
    B, N, D = x.shape
    y = ff_fused(x.reshape(B * N, D), ln_g, ln_b, p)
    return y.reshape(B, N, D)


def basic_transformer_block(x, context, kp):
    x = cross_attention_block(x, kp["attn1"], kp["ln1_g"], kp["ln1_b"])
    x = cross_attention_block(x, kp["attn2"], kp["ln2_g"], kp["ln2_b"], context=context)
    x = feed_forward_block(x, kp["ff"], kp["ln3_g"], kp["ln3_b"])
    return x


# ---------------------------- params ----------------------------

def init_params(key, dim, head_dim, heads, context_dim=None, ff_mult=4):
    """PyTorch-convention ([out, in], f32) parameters — used by the reference."""
    hidden = head_dim * heads
    if context_dim is None:
        context_dim = dim
    ff_hidden = int(dim * ff_mult)
    keys = jax.random.split(key, 12)

    def w(k, shape, scale=0.02):
        return jax.random.normal(k, shape, jnp.float32) * scale

    return {
        "ln1_g": jnp.ones((dim,), jnp.float32), "ln1_b": jnp.zeros((dim,), jnp.float32),
        "ln2_g": jnp.ones((dim,), jnp.float32), "ln2_b": jnp.zeros((dim,), jnp.float32),
        "ln3_g": jnp.ones((dim,), jnp.float32), "ln3_b": jnp.zeros((dim,), jnp.float32),
        "attn1": {
            "wq": w(keys[0], (hidden, dim)),
            "wk": w(keys[1], (hidden, dim)),
            "wv": w(keys[2], (hidden, dim)),
            "wo": w(keys[3], (dim, hidden)),
            "bo": w(keys[4], (dim,)),
            "heads": heads, "head_dim": head_dim,
        },
        "attn2": {
            "wq": w(keys[5], (hidden, dim)),
            "wk": w(keys[6], (hidden, context_dim)),
            "wv": w(keys[7], (hidden, context_dim)),
            "wo": w(keys[8], (dim, hidden)),
            "bo": w(keys[9], (dim,)),
            "heads": heads, "head_dim": head_dim,
        },
        "ff": {
            "w1": w(keys[10], (2 * ff_hidden, dim)),
            "b1": jnp.zeros((2 * ff_hidden,), jnp.float32),
            "w2": w(keys[11], (dim, ff_hidden)),
            "b2": jnp.zeros((dim,), jnp.float32),
        },
    }


def prepare_params(p):
    """One-time prep: head-major bf16 weights, softmax scale folded into Wq,
    GEGLU weight split into value/gate halves, bf16 FF weights, f32 biases."""
    def hm_in(w, heads, hd):
        # PyTorch (hidden, in) -> (heads, in, hd) bf16  (x @ w.T, per-head column slice)
        hidden, din = w.shape
        return jnp.asarray(w.reshape(heads, hd, din).transpose(0, 2, 1), jnp.bfloat16)

    def hm_out(w, heads, hd):
        # PyTorch (dim, hidden) -> (heads, hd, dim) bf16  (o @ w.T, per-head row slice)
        dim, hidden = w.shape
        return jnp.asarray(w.T.reshape(heads, hd, dim), jnp.bfloat16)

    out = {k: p[k] for k in ("ln1_g", "ln1_b", "ln2_g", "ln2_b", "ln3_g", "ln3_b")}
    for name in ("attn1", "attn2"):
        a = p[name]
        H, hd = a["heads"], a["head_dim"]
        dim = a["wo"].shape[0]
        scale = hd ** (-0.5)
        out[name] = {
            "wq": hm_in(a["wq"] * scale, H, hd),   # scale folded in once, for free
            "wk": hm_in(a["wk"], H, hd),
            "wv": hm_in(a["wv"], H, hd),
            "wo": hm_out(a["wo"], H, hd),
            "bo": a["bo"].reshape(1, dim).astype(jnp.float32),
            "heads": H, "head_dim": hd,
        }
    ff = p["ff"]
    ffh = ff["w2"].shape[1]
    dim = ff["w2"].shape[0]
    out["ff"] = {
        "wa": jnp.asarray(ff["w1"][:ffh].T, jnp.bfloat16),
        "ba": ff["b1"][:ffh].reshape(1, ffh).astype(jnp.float32),
        "wg": jnp.asarray(ff["w1"][ffh:].T, jnp.bfloat16),
        "bg": ff["b1"][ffh:].reshape(1, ffh).astype(jnp.float32),
        "w2": jnp.asarray(ff["w2"].T, jnp.bfloat16),
        "b2": ff["b2"].reshape(1, dim).astype(jnp.float32),
    }
    return out


# ---------------------------- pure-JAX reference (sanity check) ----------------------------

def _reference(x, context, params):
    def ln(x, g, b):
        mu = jnp.mean(x, -1, keepdims=True)
        var = jnp.mean((x - mu) ** 2, -1, keepdims=True)
        return (x - mu) / jnp.sqrt(var + _LN_EPS) * g + b

    def attn(x, p, ctx=None):
        h, hd = p["heads"], p["head_dim"]
        B, N, D = x.shape
        c = x if ctx is None else ctx
        M = c.shape[1]
        q = x @ p["wq"].T
        k = c @ p["wk"].T
        v = c @ p["wv"].T
        sh = lambda t, L: t.reshape(B, L, h, hd).transpose(0, 2, 1, 3)
        q, k, v = sh(q, N), sh(k, M), sh(v, M)
        sim = jnp.einsum("bhid,bhjd->bhij", q, k) * (hd ** -0.5)
        a = jax.nn.softmax(sim, -1)
        o = jnp.einsum("bhij,bhjd->bhid", a, v).transpose(0, 2, 1, 3).reshape(B, N, h * hd)
        return o @ p["wo"].T + p["bo"]

    def ff(x, p):
        pr = x @ p["w1"].T + p["b1"]
        half = p["w1"].shape[0] // 2
        a, g = pr[..., :half], pr[..., half:]
        return (a * 0.5 * g * (1 + jax.lax.erf(g * _INV_SQRT2))) @ p["w2"].T + p["b2"]

    x = attn(ln(x, params["ln1_g"], params["ln1_b"]), params["attn1"]) + x
    x = attn(ln(x, params["ln2_g"], params["ln2_b"]), params["attn2"], ctx=context) + x
    x = ff(ln(x, params["ln3_g"], params["ln3_b"]), params["ff"]) + x
    return x


# ---------------------------- main ----------------------------

if __name__ == "__main__":
    B, N, DIM = 2, 8, 32
    HEAD_DIM, HEADS = 8, 4
    M_CTX, CTX_DIM = 8, 16

    key = jax.random.PRNGKey(0)
    kx, kc, kp = jax.random.split(key, 3)
    x = jax.random.normal(kx, (B, N, DIM), jnp.float32)
    context = jax.random.normal(kc, (B, M_CTX, CTX_DIM), jnp.float32)
    params = init_params(kp, DIM, HEAD_DIM, HEADS, context_dim=CTX_DIM)
    kparams = prepare_params(params)

    out = jax.block_until_ready(basic_transformer_block(x, context, kparams))
    ref = jax.block_until_ready(_reference(x, context, params))

    assert out.shape == (B, N, DIM)
    # bf16 MXU matmuls + approx reciprocal vs f32 reference -> loosened tolerance.
    assert jnp.allclose(out, ref, atol=3e-2, rtol=3e-2), "mismatch vs pure-JAX reference"

    print("KERNEL_OK")
</pallas_src>

<mosaic_0001>
module attributes {stable_mosaic.version = 11 : i64} {
  func.func @kernel(%arg0: i32, %arg1: i32, %arg2: memref<1x8x32xf32, #tpu.memory_space<vmem>>, %arg3: memref<1x32xf32, #tpu.memory_space<vmem>>, %arg4: memref<1x32xf32, #tpu.memory_space<vmem>>, %arg5: memref<4x32x8xbf16, #tpu.memory_space<vmem>>, %arg6: memref<4x32x8xbf16, #tpu.memory_space<vmem>>, %arg7: memref<4x32x8xbf16, #tpu.memory_space<vmem>>, %arg8: memref<4x1x8x8xbf16, #tpu.memory_space<vmem>>, %arg9: memref<4x1x8x8xbf16, #tpu.memory_space<vmem>>, %arg10: memref<4x1x8x8xbf16, #tpu.memory_space<vmem>>) attributes {dimension_semantics = [#tpu.dimension_semantics<parallel>, #tpu.dimension_semantics<parallel>], iteration_bounds = array<i64: 2, 1>, scalar_prefetch = 0 : i64, scratch_operands = 0 : i64, tpu.core_type = #tpu.core_type<tc>, window_params = [{transform_indices = @transform_0, window_bounds = array<i64: 1, 8, 32>}, {pipeline_mode = #tpu.pipeline_mode<synchronous>, transform_indices = @transform_1, window_bounds = array<i64: 1, 32>}, {pipeline_mode = #tpu.pipeline_mode<synchronous>, transform_indices = @transform_2, window_bounds = array<i64: 1, 32>}, {pipeline_mode = #tpu.pipeline_mode<synchronous>, transform_indices = @transform_3, window_bounds = array<i64: 4, 32, 8>}, {pipeline_mode = #tpu.pipeline_mode<synchronous>, transform_indices = @transform_4, window_bounds = array<i64: 4, 32, 8>}, {pipeline_mode = #tpu.pipeline_mode<synchronous>, transform_indices = @transform_5, window_bounds = array<i64: 4, 32, 8>}, {transform_indices = @transform_6, window_bounds = array<i64: 4, 1, 8, 8>}, {transform_indices = @transform_7, window_bounds = array<i64: 4, 1, 8, 8>}, {transform_indices = @transform_8, window_bounds = array<i64: 4, 1, 8, 8>}]} {
    %c0 = arith.constant 0 : index
    %c0_0 = arith.constant 0 : index
    %c0_1 = arith.constant 0 : index
    %0 = vector.load %arg2[%c0, %c0_0, %c0_1] : memref<1x8x32xf32, #tpu.memory_space<vmem>>, vector<1x8x32xf32>
    %1 = vector.shape_cast %0 : vector<1x8x32xf32> to vector<8x32xf32>
    %c0_2 = arith.constant 0 : index
    %c0_3 = arith.constant 0 : index
    %2 = vector.load %arg3[%c0_2, %c0_3] : memref<1x32xf32, #tpu.memory_space<vmem>>, vector<1x32xf32>
    %c0_4 = arith.constant 0 : index
    %c0_5 = arith.constant 0 : index
    %3 = vector.load %arg4[%c0_4, %c0_5] : memref<1x32xf32, #tpu.memory_space<vmem>>, vector<1x32xf32>
    %cst = arith.constant dense<0.000000e+00> : vector<8xf32>
    %4 = vector.multi_reduction <add>, %1, %cst [1] : vector<8x32xf32> to vector<8xf32>
    %5 = vector.shape_cast %4 : vector<8xf32> to vector<8x1xf32>
    %cst_6 = arith.constant 3.200000e+01 : f32
    %6 = vector.broadcast %cst_6 : f32 to vector<8x1xf32>
    %7 = arith.divf %5, %6 : vector<8x1xf32>
    %8 = vector.broadcast %7 : vector<8x1xf32> to vector<8x32xf32>
    %9 = arith.subf %1, %8 : vector<8x32xf32>
    %10 = arith.mulf %9, %9 : vector<8x32xf32>
    %cst_7 = arith.constant dense<0.000000e+00> : vector<8xf32>
    %11 = vector.multi_reduction <add>, %10, %cst_7 [1] : vector<8x32xf32> to vector<8xf32>
    %12 = vector.shape_cast %11 : vector<8xf32> to vector<8x1xf32>
    %cst_8 = arith.constant 3.200000e+01 : f32
    %13 = vector.broadcast %cst_8 : f32 to vector<8x1xf32>
    %14 = arith.divf %12, %13 : vector<8x1xf32>
    %15 = vector.broadcast %7 : vector<8x1xf32> to vector<8x32xf32>
    %16 = arith.subf %1, %15 : vector<8x32xf32>
    %cst_9 = arith.constant 9.99999974E-6 : f32
    %17 = vector.broadcast %cst_9 : f32 to vector<8x1xf32>
    %18 = arith.addf %14, %17 : vector<8x1xf32>
    %19 = math.rsqrt %18 : vector<8x1xf32>
    %20 = vector.broadcast %19 : vector<8x1xf32> to vector<8x32xf32>
    %21 = arith.mulf %16, %20 : vector<8x32xf32>
    %22 = vector.broadcast %2 : vector<1x32xf32> to vector<8x32xf32>
    %23 = arith.mulf %21, %22 : vector<8x32xf32>
    %24 = vector.broadcast %3 : vector<1x32xf32> to vector<8x32xf32>
    %25 = arith.addf %23, %24 : vector<8x32xf32>
    %26 = arith.truncf %25 : vector<8x32xf32> to vector<8x32xbf16>
    %c0_10 = arith.constant 0 : index
    %c0_11 = arith.constant 0 : index
    %c0_12 = arith.constant 0 : index
    %27 = vector.load %arg5[%c0_10, %c0_11, %c0_12] : memref<4x32x8xbf16, #tpu.memory_space<vmem>>, vector<1x32x8xbf16>
    %28 = vector.shape_cast %27 : vector<1x32x8xbf16> to vector<32x8xbf16>
    %cst_13 = arith.constant dense<0.000000e+00> : vector<8x8xf32>
    %29 = tpu.matmul %26, %28, %cst_13 {dimension_numbers = #tpu.dot_dimension_numbers<[1], [0], [0], [1], [0, 0, 1, 1], [], []>} : vector<8x32xbf16>, vector<32x8xbf16>, vector<8x8xf32> -> vector<8x8xf32>
    %30 = arith.truncf %29 : vector<8x8xf32> to vector<8x8xbf16>
    %c0_14 = arith.constant 0 : index
    %c0_15 = arith.constant 0 : index
    %c0_16 = arith.constant 0 : index
    %c0_17 = arith.constant 0 : index
    %31 = vector.load %arg8[%c0_14, %c0_15, %c0_16, %c0_17] : memref<4x1x8x8xbf16, #tpu.memory_space<vmem>>, vector<1x1x8x8xbf16>
    %32 = vector.shape_cast %31 : vector<1x1x8x8xbf16> to vector<8x8xbf16>
    %33 = vector.shape_cast %30 : vector<8x8xbf16> to vector<1x1x8x8xbf16>
    tpu.vector_store %arg8[%c0_14, %c0_15, %c0_16, %c0_17], %33 {strides = array<i32>} : memref<4x1x8x8xbf16, #tpu.memory_space<vmem>>, vector<1x1x8x8xbf16>,
    %c1 = arith.constant 1 : index
    %c0_18 = arith.constant 0 : index
    %c0_19 = arith.constant 0 : index
    %34 = vector.load %arg5[%c1, %c0_18, %c0_19] : memref<4x32x8xbf16, #tpu.memory_space<vmem>>, vector<1x32x8xbf16>
    %35 = vector.shape_cast %34 : vector<1x32x8xbf16> to vector<32x8xbf16>
    %cst_20 = arith.constant dense<0.000000e+00> : vector<8x8xf32>
    %36 = tpu.matmul %26, %35, %cst_20 {dimension_numbers = #tpu.dot_dimension_numbers<[1], [0], [0], [1], [0, 0, 1, 1], [], []>} : vector<8x32xbf16>, vector<32x8xbf16>, vector<8x8xf32> -> vector<8x8xf32>
    %37 = arith.truncf %36 : vector<8x8xf32> to vector<8x8xbf16>
    %c1_21 = arith.constant 1 : index
    %c0_22 = arith.constant 0 : index
    %c0_23 = arith.constant 0 : index
    %c0_24 = arith.constant 0 : index
    %38 = vector.load %arg8[%c1_21, %c0_22, %c0_23, %c0_24] : memref<4x1x8x8xbf16, #tpu.memory_space<vmem>>, vector<1x1x8x8xbf16>
    %39 = vector.shape_cast %38 : vector<1x1x8x8xbf16> to vector<8x8xbf16>
    %40 = vector.shape_cast %37 : vector<8x8xbf16> to vector<1x1x8x8xbf16>
    tpu.vector_store %arg8[%c1_21, %c0_22, %c0_23, %c0_24], %40 {strides = array<i32>} : memref<4x1x8x8xbf16, #tpu.memory_space<vmem>>, vector<1x1x8x8xbf16>,
    %c2 = arith.constant 2 : index
    %c0_25 = arith.constant 0 : index
    %c0_26 = arith.constant 0 : index
    %41 = vector.load %arg5[%c2, %c0_25, %c0_26] : memref<4x32x8xbf16, #tpu.memory_space<vmem>>, vector<1x32x8xbf16>
    %42 = vector.shape_cast %41 : vector<1x32x8xbf16> to vector<32x8xbf16>
    %cst_27 = arith.constant dense<0.000000e+00> : vector<8x8xf32>
    %43 = tpu.matmul %26, %42, %cst_27 {dimension_numbers = #tpu.dot_dimension_numbers<[1], [0], [0], [1], [0, 0, 1, 1], [], []>} : vector<8x32xbf16>, vector<32x8xbf16>, vector<8x8xf32> -> vector<8x8xf32>
    %44 = arith.truncf %43 : vector<8x8xf32> to vector<8x8xbf16>
    %c2_28 = arith.constant 2 : index
    %c0_29 = arith.constant 0 : index
    %c0_30 = arith.constant 0 : index
    %c0_31 = arith.constant 0 : index
    %45 = vector.load %arg8[%c2_28, %c0_29, %c0_30, %c0_31] : memref<4x1x8x8xbf16, #tpu.memory_space<vmem>>, vector<1x1x8x8xbf16>
    %46 = vector.shape_cast %45 : vector<1x1x8x8xbf16> to vector<8x8xbf16>
    %47 = vector.shape_cast %44 : vector<8x8xbf16> to vector<1x1x8x8xbf16>
    tpu.vector_store %arg8[%c2_28, %c0_29, %c0_30, %c0_31], %47 {strides = array<i32>} : memref<4x1x8x8xbf16, #tpu.memory_space<vmem>>, vector<1x1x8x8xbf16>,
    %c3 = arith.constant 3 : index
    %c0_32 = arith.constant 0 : index
    %c0_33 = arith.constant 0 : index
    %48 = vector.load %arg5[%c3, %c0_32, %c0_33] : memref<4x32x8xbf16, #tpu.memory_space<vmem>>, vector<1x32x8xbf16>
    %49 = vector.shape_cast %48 : vector<1x32x8xbf16> to vector<32x8xbf16>
    %cst_34 = arith.constant dense<0.000000e+00> : vector<8x8xf32>
    %50 = tpu.matmul %26, %49, %cst_34 {dimension_numbers = #tpu.dot_dimension_numbers<[1], [0], [0], [1], [0, 0, 1, 1], [], []>} : vector<8x32xbf16>, vector<32x8xbf16>, vector<8x8xf32> -> vector<8x8xf32>
    %51 = arith.truncf %50 : vector<8x8xf32> to vector<8x8xbf16>
    %c3_35 = arith.constant 3 : index
    %c0_36 = arith.constant 0 : index
    %c0_37 = arith.constant 0 : index
    %c0_38 = arith.constant 0 : index
    %52 = vector.load %arg8[%c3_35, %c0_36, %c0_37, %c0_38] : memref<4x1x8x8xbf16, #tpu.memory_space<vmem>>, vector<1x1x8x8xbf16>
    %53 = vector.shape_cast %52 : vector<1x1x8x8xbf16> to vector<8x8xbf16>
    %54 = vector.shape_cast %51 : vector<8x8xbf16> to vector<1x1x8x8xbf16>
    tpu.vector_store %arg8[%c3_35, %c0_36, %c0_37, %c0_38], %54 {strides = array<i32>} : memref<4x1x8x8xbf16, #tpu.memory_space<vmem>>, vector<1x1x8x8xbf16>,
    %c0_39 = arith.constant 0 : index
    %c0_40 = arith.constant 0 : index
    %c0_41 = arith.constant 0 : index
    %55 = vector.load %arg6[%c0_39, %c0_40, %c0_41] : memref<4x32x8xbf16, #tpu.memory_space<vmem>>, vector<1x32x8xbf16>
    %56 = vector.shape_cast %55 : vector<1x32x8xbf16> to vector<32x8xbf16>
    %cst_42 = arith.constant dense<0.000000e+00> : vector<8x8xf32>
    %57 = tpu.matmul %26, %56, %cst_42 {dimension_numbers = #tpu.dot_dimension_numbers<[1], [0], [0], [1], [0, 0, 1, 1], [], []>} : vector<8x32xbf16>, vector<32x8xbf16>, vector<8x8xf32> -> vector<8x8xf32>
    %58 = arith.truncf %57 : vector<8x8xf32> to vector<8x8xbf16>
    %c0_43 = arith.constant 0 : index
    %c0_44 = arith.constant 0 : index
    %c0_45 = arith.constant 0 : index
    %c0_46 = arith.constant 0 : index
    %59 = vector.load %arg9[%c0_43, %c0_44, %c0_45, %c0_46] : memref<4x1x8x8xbf16, #tpu.memory_space<vmem>>, vector<1x1x8x8xbf16>
    %60 = vector.shape_cast %59 : vector<1x1x8x8xbf16> to vector<8x8xbf16>
    %61 = vector.shape_cast %58 : vector<8x8xbf16> to vector<1x1x8x8xbf16>
    tpu.vector_store %arg9[%c0_43, %c0_44, %c0_45, %c0_46], %61 {strides = array<i32>} : memref<4x1x8x8xbf16, #tpu.memory_space<vmem>>, vector<1x1x8x8xbf16>,
    %c1_47 = arith.constant 1 : index
    %c0_48 = arith.constant 0 : index
    %c0_49 = arith.constant 0 : index
    %62 = vector.load %arg6[%c1_47, %c0_48, %c0_49] : memref<4x32x8xbf16, #tpu.memory_space<vmem>>, vector<1x32x8xbf16>
    %63 = vector.shape_cast %62 : vector<1x32x8xbf16> to vector<32x8xbf16>
    %cst_50 = arith.constant dense<0.000000e+00> : vector<8x8xf32>
    %64 = tpu.matmul %26, %63, %cst_50 {dimension_numbers = #tpu.dot_dimension_numbers<[1], [0], [0], [1], [0, 0, 1, 1], [], []>} : vector<8x32xbf16>, vector<32x8xbf16>, vector<8x8xf32> -> vector<8x8xf32>
    %65 = arith.truncf %64 : vector<8x8xf32> to vector<8x8xbf16>
    %c1_51 = arith.constant 1 : index
    %c0_52 = arith.constant 0 : index
    %c0_53 = arith.constant 0 : index
    %c0_54 = arith.constant 0 : index
    %66 = vector.load %arg9[%c1_51, %c0_52, %c0_53, %c0_54] : memref<4x1x8x8xbf16, #tpu.memory_space<vmem>>, vector<1x1x8x8xbf16>
    %67 = vector.shape_cast %66 : vector<1x1x8x8xbf16> to vector<8x8xbf16>
    %68 = vector.shape_cast %65 : vector<8x8xbf16> to vector<1x1x8x8xbf16>
    tpu.vector_store %arg9[%c1_51, %c0_52, %c0_53, %c0_54], %68 {strides = array<i32>} : memref<4x1x8x8xbf16, #tpu.memory_space<vmem>>, vector<1x1x8x8xbf16>,
    %c2_55 = arith.constant 2 : index
    %c0_56 = arith.constant 0 : index
    %c0_57 = arith.constant 0 : index
    %69 = vector.load %arg6[%c2_55, %c0_56, %c0_57] : memref<4x32x8xbf16, #tpu.memory_space<vmem>>, vector<1x32x8xbf16>
    %70 = vector.shape_cast %69 : vector<1x32x8xbf16> to vector<32x8xbf16>
    %cst_58 = arith.constant dense<0.000000e+00> : vector<8x8xf32>
    %71 = tpu.matmul %26, %70, %cst_58 {dimension_numbers = #tpu.dot_dimension_numbers<[1], [0], [0], [1], [0, 0, 1, 1], [], []>} : vector<8x32xbf16>, vector<32x8xbf16>, vector<8x8xf32> -> vector<8x8xf32>
    %72 = arith.truncf %71 : vector<8x8xf32> to vector<8x8xbf16>
    %c2_59 = arith.constant 2 : index
    %c0_60 = arith.constant 0 : index
    %c0_61 = arith.constant 0 : index
    %c0_62 = arith.constant 0 : index
    %73 = vector.load %arg9[%c2_59, %c0_60, %c0_61, %c0_62] : memref<4x1x8x8xbf16, #tpu.memory_space<vmem>>, vector<1x1x8x8xbf16>
    %74 = vector.shape_cast %73 : vector<1x1x8x8xbf16> to vector<8x8xbf16>
    %75 = vector.shape_cast %72 : vector<8x8xbf16> to vector<1x1x8x8xbf16>
    tpu.vector_store %arg9[%c2_59, %c0_60, %c0_61, %c0_62], %75 {strides = array<i32>} : memref<4x1x8x8xbf16, #tpu.memory_space<vmem>>, vector<1x1x8x8xbf16>,
    %c3_63 = arith.constant 3 : index
    %c0_64 = arith.constant 0 : index
    %c0_65 = arith.constant 0 : index
    %76 = vector.load %arg6[%c3_63, %c0_64, %c0_65] : memref<4x32x8xbf16, #tpu.memory_space<vmem>>, vector<1x32x8xbf16>
    %77 = vector.shape_cast %76 : vector<1x32x8xbf16> to vector<32x8xbf16>
    %cst_66 = arith.constant dense<0.000000e+00> : vector<8x8xf32>
    %78 = tpu.matmul %26, %77, %cst_66 {dimension_numbers = #tpu.dot_dimension_numbers<[1], [0], [0], [1], [0, 0, 1, 1], [], []>} : vector<8x32xbf16>, vector<32x8xbf16>, vector<8x8xf32> -> vector<8x8xf32>
    %79 = arith.truncf %78 : vector<8x8xf32> to vector<8x8xbf16>
    %c3_67 = arith.constant 3 : index
    %c0_68 = arith.constant 0 : index
    %c0_69 = arith.constant 0 : index
    %c0_70 = arith.constant 0 : index
    %80 = vector.load %arg9[%c3_67, %c0_68, %c0_69, %c0_70] : memref<4x1x8x8xbf16, #tpu.memory_space<vmem>>, vector<1x1x8x8xbf16>
    %81 = vector.shape_cast %80 : vector<1x1x8x8xbf16> to vector<8x8xbf16>
    %82 = vector.shape_cast %79 : vector<8x8xbf16> to vector<1x1x8x8xbf16>
    tpu.vector_store %arg9[%c3_67, %c0_68, %c0_69, %c0_70], %82 {strides = array<i32>} : memref<4x1x8x8xbf16, #tpu.memory_space<vmem>>, vector<1x1x8x8xbf16>,
    %c0_71 = arith.constant 0 : index
    %c0_72 = arith.constant 0 : index
    %c0_73 = arith.constant 0 : index
    %83 = vector.load %arg7[%c0_71, %c0_72, %c0_73] : memref<4x32x8xbf16, #tpu.memory_space<vmem>>, vector<1x32x8xbf16>
    %84 = vector.shape_cast %83 : vector<1x32x8xbf16> to vector<32x8xbf16>
    %cst_74 = arith.constant dense<0.000000e+00> : vector<8x8xf32>
    %85 = tpu.matmul %26, %84, %cst_74 {dimension_numbers = #tpu.dot_dimension_numbers<[1], [0], [0], [1], [0, 0, 1, 1], [], []>} : vector<8x32xbf16>, vector<32x8xbf16>, vector<8x8xf32> -> vector<8x8xf32>
    %86 = arith.truncf %85 : vector<8x8xf32> to vector<8x8xbf16>
    %c0_75 = arith.constant 0 : index
    %c0_76 = arith.constant 0 : index
    %c0_77 = arith.constant 0 : index
    %c0_78 = arith.constant 0 : index
    %87 = vector.load %arg10[%c0_75, %c0_76, %c0_77, %c0_78] : memref<4x1x8x8xbf16, #tpu.memory_space<vmem>>, vector<1x1x8x8xbf16>
    %88 = vector.shape_cast %87 : vector<1x1x8x8xbf16> to vector<8x8xbf16>
    %89 = vector.shape_cast %86 : vector<8x8xbf16> to vector<1x1x8x8xbf16>
    tpu.vector_store %arg10[%c0_75, %c0_76, %c0_77, %c0_78], %89 {strides = array<i32>} : memref<4x1x8x8xbf16, #tpu.memory_space<vmem>>, vector<1x1x8x8xbf16>,
    %c1_79 = arith.constant 1 : index
    %c0_80 = arith.constant 0 : index
    %c0_81 = arith.constant 0 : index
    %90 = vector.load %arg7[%c1_79, %c0_80, %c0_81] : memref<4x32x8xbf16, #tpu.memory_space<vmem>>, vector<1x32x8xbf16>
    %91 = vector.shape_cast %90 : vector<1x32x8xbf16> to vector<32x8xbf16>
    %cst_82 = arith.constant dense<0.000000e+00> : vector<8x8xf32>
    %92 = tpu.matmul %26, %91, %cst_82 {dimension_numbers = #tpu.dot_dimension_numbers<[1], [0], [0], [1], [0, 0, 1, 1], [], []>} : vector<8x32xbf16>, vector<32x8xbf16>, vector<8x8xf32> -> vector<8x8xf32>
    %93 = arith.truncf %92 : vector<8x8xf32> to vector<8x8xbf16>
    %c1_83 = arith.constant 1 : index
    %c0_84 = arith.constant 0 : index
    %c0_85 = arith.constant 0 : index
    %c0_86 = arith.constant 0 : index
    %94 = vector.load %arg10[%c1_83, %c0_84, %c0_85, %c0_86] : memref<4x1x8x8xbf16, #tpu.memory_space<vmem>>, vector<1x1x8x8xbf16>
    %95 = vector.shape_cast %94 : vector<1x1x8x8xbf16> to vector<8x8xbf16>
    %96 = vector.shape_cast %93 : vector<8x8xbf16> to vector<1x1x8x8xbf16>
    tpu.vector_store %arg10[%c1_83, %c0_84, %c0_85, %c0_86], %96 {strides = array<i32>} : memref<4x1x8x8xbf16, #tpu.memory_space<vmem>>, vector<1x1x8x8xbf16>,
    %c2_87 = arith.constant 2 : index
    %c0_88 = arith.constant 0 : index
    %c0_89 = arith.constant 0 : index
    %97 = vector.load %arg7[%c2_87, %c0_88, %c0_89] : memref<4x32x8xbf16, #tpu.memory_space<vmem>>, vector<1x32x8xbf16>
    %98 = vector.shape_cast %97 : vector<1x32x8xbf16> to vector<32x8xbf16>
    %cst_90 = arith.constant dense<0.000000e+00> : vector<8x8xf32>
    %99 = tpu.matmul %26, %98, %cst_90 {dimension_numbers = #tpu.dot_dimension_numbers<[1], [0], [0], [1], [0, 0, 1, 1], [], []>} : vector<8x32xbf16>, vector<32x8xbf16>, vector<8x8xf32> -> vector<8x8xf32>
    %100 = arith.truncf %99 : vector<8x8xf32> to vector<8x8xbf16>
    %c2_91 = arith.constant 2 : index
    %c0_92 = arith.constant 0 : index
    %c0_93 = arith.constant 0 : index
    %c0_94 = arith.constant 0 : index
    %101 = vector.load %arg10[%c2_91, %c0_92, %c0_93, %c0_94] : memref<4x1x8x8xbf16, #tpu.memory_space<vmem>>, vector<1x1x8x8xbf16>
    %102 = vector.shape_cast %101 : vector<1x1x8x8xbf16> to vector<8x8xbf16>
    %103 = vector.shape_cast %100 : vector<8x8xbf16> to vector<1x1x8x8xbf16>
    tpu.vector_store %arg10[%c2_91, %c0_92, %c0_93, %c0_94], %103 {strides = array<i32>} : memref<4x1x8x8xbf16, #tpu.memory_space<vmem>>, vector<1x1x8x8xbf16>,
    %c3_95 = arith.constant 3 : index
    %c0_96 = arith.constant 0 : index
    %c0_97 = arith.constant 0 : index
    %104 = vector.load %arg7[%c3_95, %c0_96, %c0_97] : memref<4x32x8xbf16, #tpu.memory_space<vmem>>, vector<1x32x8xbf16>
    %105 = vector.shape_cast %104 : vector<1x32x8xbf16> to vector<32x8xbf16>
    %cst_98 = arith.constant dense<0.000000e+00> : vector<8x8xf32>
    %106 = tpu.matmul %26, %105, %cst_98 {dimension_numbers = #tpu.dot_dimension_numbers<[1], [0], [0], [1], [0, 0, 1, 1], [], []>} : vector<8x32xbf16>, vector<32x8xbf16>, vector<8x8xf32> -> vector<8x8xf32>
    %107 = arith.truncf %106 : vector<8x8xf32> to vector<8x8xbf16>
    %c3_99 = arith.constant 3 : index
    %c0_100 = arith.constant 0 : index
    %c0_101 = arith.constant 0 : index
    %c0_102 = arith.constant 0 : index
    %108 = vector.load %arg10[%c3_99, %c0_100, %c0_101, %c0_102] : memref<4x1x8x8xbf16, #tpu.memory_space<vmem>>, vector<1x1x8x8xbf16>
    %109 = vector.shape_cast %108 : vector<1x1x8x8xbf16> to vector<8x8xbf16>
    %110 = vector.shape_cast %107 : vector<8x8xbf16> to vector<1x1x8x8xbf16>
    tpu.vector_store %arg10[%c3_99, %c0_100, %c0_101, %c0_102], %110 {strides = array<i32>} : memref<4x1x8x8xbf16, #tpu.memory_space<vmem>>, vector<1x1x8x8xbf16>,
    return
  }
  func.func @transform_0(%arg0: i32, %arg1: i32) -> (i32, i32, i32) {
    %c0_i32 = arith.constant 0 : i32
    %c0_i32_0 = arith.constant 0 : i32
    return %arg0, %arg1, %c0_i32 : i32, i32, i32
  }
  func.func @transform_1(%arg0: i32, %arg1: i32) -> (i32, i32) {
    %c0_i32 = arith.constant 0 : i32
    %c0_i32_0 = arith.constant 0 : i32
    %c0_i32_1 = arith.constant 0 : i32
    return %c0_i32, %c0_i32_0 : i32, i32
  }
  func.func @transform_2(%arg0: i32, %arg1: i32) -> (i32, i32) {
    %c0_i32 = arith.constant 0 : i32
    %c0_i32_0 = arith.constant 0 : i32
    %c0_i32_1 = arith.constant 0 : i32
    return %c0_i32, %c0_i32_0 : i32, i32
  }
  func.func @transform_3(%arg0: i32, %arg1: i32) -> (i32, i32, i32) {
    %c0_i32 = arith.constant 0 : i32
    %c0_i32_0 = arith.constant 0 : i32
    %c0_i32_1 = arith.constant 0 : i32
    %c0_i32_2 = arith.constant 0 : i32
    return %c0_i32, %c0_i32_0, %c0_i32_1 : i32, i32, i32
  }
  func.func @transform_4(%arg0: i32, %arg1: i32) -> (i32, i32, i32) {
    %c0_i32 = arith.constant 0 : i32
    %c0_i32_0 = arith.constant 0 : i32
    %c0_i32_1 = arith.constant 0 : i32
    %c0_i32_2 = arith.constant 0 : i32
    return %c0_i32, %c0_i32_0, %c0_i32_1 : i32, i32, i32
  }
  func.func @transform_5(%arg0: i32, %arg1: i32) -> (i32, i32, i32) {
    %c0_i32 = arith.constant 0 : i32
    %c0_i32_0 = arith.constant 0 : i32
    %c0_i32_1 = arith.constant 0 : i32
    %c0_i32_2 = arith.constant 0 : i32
    return %c0_i32, %c0_i32_0, %c0_i32_1 : i32, i32, i32
  }
  func.func @transform_6(%arg0: i32, %arg1: i32) -> (i32, i32, i32, i32) {
    %c0_i32 = arith.constant 0 : i32
    %c0_i32_0 = arith.constant 0 : i32
    %c0_i32_1 = arith.constant 0 : i32
    return %c0_i32, %arg0, %arg1, %c0_i32_0 : i32, i32, i32, i32
  }
  func.func @transform_7(%arg0: i32, %arg1: i32) -> (i32, i32, i32, i32) {
    %c0_i32 = arith.constant 0 : i32
    %c0_i32_0 = arith.constant 0 : i32
    %c0_i32_1 = arith.constant 0 : i32
    return %c0_i32, %arg0, %arg1, %c0_i32_0 : i32, i32, i32, i32
  }
  func.func @transform_8(%arg0: i32, %arg1: i32) -> (i32, i32, i32, i32) {
    %c0_i32 = arith.constant 0 : i32
    %c0_i32_0 = arith.constant 0 : i32
    %c0_i32_1 = arith.constant 0 : i32
    return %c0_i32, %arg0, %arg1, %c0_i32_0 : i32, i32, i32, i32
  }
}

</mosaic_0001>

<bundles_post_ra>
// kernel: tpu_custom_call.1
= control target key start
LH: loop header
LB: loop body
LE: loop exit
PB: predicated region body
PF: predicated region fallthrough
CT: control target
= control target key end

     0   :  { %s2189_s0 = inlined_call_operand.vmem [shape: f32[2,8,32], index: 0, kind: input, shape index: {}]   ;;  %s2190_s1 = inlined_call_operand.vmem [shape: f32[1,32], index: 1, kind: input, shape index: {}]   ;;  %s2191_s2 = inlined_call_operand.vmem [shape: f32[1,32], index: 2, kind: input, shape index: {}]   ;;  %s2192_s3 = inlined_call_operand.vmem [shape: bf16[4,32,8], index: 3, kind: input, shape index: {}]   ;;  %s2193_s4 = inlined_call_operand.vmem [shape: bf16[4,32,8], index: 4, kind: input, shape index: {}]   ;;  %s2194_s5 = inlined_call_operand.vmem [shape: bf16[4,32,8], index: 5, kind: input, shape index: {}]   ;;  %s2195_s6 = inlined_call_operand.hbm [shape: bf16[4,2,8,8], index: 6, kind: output, shape index: {0}]   ;;  %s2196_s7 = inlined_call_operand.hbm [shape: bf16[4,2,8,8], index: 7, kind: output, shape index: {1}]   ;;  %s2197_s8 = inlined_call_operand.hbm [shape: bf16[4,2,8,8], index: 8, kind: output, shape index: {2}]  }
   0x1   :  { %2204 = sst [smem:[#allocation9_spill]] %s2189_s0 }
   0x2   :  { %2205 = sst [smem:[#allocation10_spill]] %s2190_s1 }
   0x3   :  { %14 = vsyncpa [#allocation3], 0 }
   0x4   :  { %16 = vsyncpa [#allocation3 + $0x1], 0 }
   0x5   :  { %17 = vsyncpa [#allocation5], 0 }
   0x6   :  { %19 = vsyncpa [#allocation5 + $0x1], 0  ;;  %s1814_s27 = smov 0   ;;  %s1816_s28 = smov 0  }
   0x7   :  { %s1818_s29 = smov 0   ;;  %s1820_s30 = smov 0  }
   0x8   :  { %s1822_s9 = smov 0   ;;  %s1824_s10 = smov 0  }
   0x9 LB: > { %s2199_s11 = sadd.s32 4294967295, %s1759_s10   ;;  %s2198_s12 = sadd.s32 4294967294, %s1759_s10   ;;  %s1759_s10 = sphi %s1824_s10, %s25_s10   ;;  %s1755_s9 = sphi %s1822_s9, %s2220_s9   ;;  %s1751_s30 = sphi %s1820_s30, %s2219_s30   ;;  %s1747_s29 = sphi %s1818_s29, %s2218_s29   ;;  %s1743_s28 = sphi %s1816_s28, %s2217_s28   ;;  %s1739_s27 = sphi %s1814_s27, %s2216_s27  }
   0xa   : > { %s37_s13 = sadd.s32 1, %s1755_s9  ;;  %s179_s14 = sadd.s32 1, %s1747_s29 }
   0xb   : > { %p39_p0 = scmp.ge.s32.totalorder %s37_s13, 2  ;;  %p189_p1 = scmp.ne.s32.totalorder %s1747_s29, %s1743_s28 }
   0xc   : > { %p190_p2 = scmp.eq.s32.totalorder %s2199_s11, 1  ;;  %p195_p3 = scmp.ne.s32.totalorder %s1743_s28, %s1739_s27 }
   0xd   : > { %s2222_s13 = smov (%p39_p0, %s37_s13), 0  ;;  %p196_p5 = scmp.eq.s32.totalorder %s2198_s12, 1 }
   0xe   : > { %p1856_p4 = por %p190_p2, %p189_p1  ;;  %s174_s16 = ssub.s32 %s1755_s9, %s2222_s13 }
   0xf   : > { %p1297_p6 = scmp.ge.s32.totalorder %s1759_s10, 1  ;;  %p177_p7 = scmp.eq.s32.totalorder %s174_s16, 0 }
  0x10   : > { %p1865_p8 = por %p196_p5, %p195_p3  ;;  %p295_p9 = scmp.lt.s32.totalorder %s1759_s10, 3 }
  0x11   : > { %s1871_s18 = scalar_select %p177_p7, %s1747_s29, %s179_s14  }
  0x12   : > { %p296_p10 = pnand %p1297_p6, %p295_p9 }
  0x13   : > { %p341_p11 = scmp.lt.s32.totalorder (!%p296_p10), %s1751_s30, 1  ;;  %vm352_vm0 = vcmask (!%p296_p10), 261120   ;;  %s2208_s0 = sld [smem:[#allocation9_spill]] (!%p296_p10)  ;;  %v1595_v7 = vld [vmem:[%s2192_s3] sm:$0xff] (!%p296_p10)   ;;  %v1596_v8 = vld [vmem:[%s2192_s3 + $0x10] sm:$0xff] (!%p296_p10)   ;;  %v1761_v9 = vmov (!%p296_p10), 0.0  }
  0x14   : > { %299 = sbr.rel (%p296_p10) target bundleno = 638 (0x27e), region = 44  ;;  %1429 = vmatprep.subr.bf16.mxu0 (!%p296_p10), %v1761_v9  ;;  %1437 = vmatprep.subr.bf16.mxu1 (!%p296_p10), %v1761_v9  ;;  %v1597_v10 = vld [vmem:[%s2192_s3 + $0x8] sm:$0xff] (!%p296_p10)   ;;  %v1598_v11 = vld [vmem:[%s2192_s3 + $0x18] sm:$0xff] (!%p296_p10)   ;;  %vm1762_vm1 = vmmov (!%p296_p10), 0   ;;  %s2209_s1 = sld [smem:[#allocation10_spill]] (!%p296_p10)  ;;  %v1599_v21 = vld [vmem:[%s2192_s3 + $0x20] sm:$0xff] (!%p296_p10)  }
  0x15   : > { %1430 = vmatpush3.bf16.msra.mxu0 (!%p296_p10), %v1595_v7  ;;  %1438 = vmatpush3.bf16.msra.mxu1 (!%p296_p10), %v1596_v8  ;;  %v1303_v18 = vld [vmem:[%s2191_s2] ss:$0 sm:$0xff] (!%p296_p10)  ;;  %v1600_v22 = vld [vmem:[%s2192_s3 + $0x30] sm:$0xff] (!%p296_p10)   ;;  %v1601_v24 = vld [vmem:[%s2192_s3 + $0x28] sm:$0xff] (!%p296_p10)   ;;  %s324_s26 = sand.u32 (!%p296_p10), 1, %s1743_s28   ;;  %vm442_vm2 = vcmask (!%p296_p10), 60416  }
  0x16   : > { %1431 = vmatprep.subr.bf16.mxu0 (!%p296_p10), %v1761_v9  ;;  %1439 = vmatprep.subr.bf16.mxu1 (!%p296_p10), %v1761_v9  ;;  %v1602_v25 = vld [vmem:[%s2192_s3 + $0x38] sm:$0xff] (!%p296_p10)   ;;  %v1603_v26 = vld [vmem:[%s2193_s4] sm:$0xff] (!%p296_p10)   ;;  %v1604_v27 = vld [vmem:[%s2193_s4 + $0x10] sm:$0xff] (!%p296_p10)   ;;  %s2035_s14 = sshll.u32 (!%p296_p10), %s324_s26, 4  ;;  %s1763_s25 = smov (!%p296_p10), [#allocation2]  }
  0x17   : > { %1433 = vmatprep.mubr.msk.bf16.mxu0 (!%p296_p10), %vm1762_vm1, %v1761_v9  ;;  %1441 = vmatprep.mubr.msk.bf16.mxu1 (!%p296_p10), %vm1762_vm1, %v1761_v9  ;;  %v1605_v28 = vld [vmem:[%s2193_s4 + $0x8] sm:$0xff] (!%p296_p10)   ;;  %v1606_v29 = vld [vmem:[%s2193_s4 + $0x18] sm:$0xff] (!%p296_p10)   ;;  %v1607_v30 = vld [vmem:[%s2193_s4 + $0x20] sm:$0xff] (!%p296_p10)   ;;  %s326_s16 = scalar_lea.vmem (!%p296_p10), [#allocation2], %s2035_s14  ;;  %s1625_s21 = sshll.u32 (!%p296_p10), %s1763_s25, 4  ;;  %s1626_s21 = int_to_ptr.vmem [resolvable:$false] %s1625_s21 }
  0x18   : > { %v1608_v31 = vld [vmem:[%s2193_s4 + $0x30] sm:$0xff] (!%p296_p10)   ;;  %v1609_v32 = vld [vmem:[%s2193_s4 + $0x28] sm:$0xff] (!%p296_p10)   ;;  %v1610_v33 = vld [vmem:[%s2193_s4 + $0x38] sm:$0xff] (!%p296_p10)   ;;  %s1627_s22 = scalar_lea.vmem (!%p296_p10), %s1626_s21, 512 }
  0x19   : > { %1432 = vmatpush3.bf16.msra.mxu0 (!%p296_p10), %v1597_v10  ;;  %1440 = vmatpush3.bf16.msra.mxu1 (!%p296_p10), %v1598_v11  ;;  %v1611_v34 = vld [vmem:[%s2194_s5] sm:$0xff] (!%p296_p10)   ;;  %v1612_v35 = vld [vmem:[%s2194_s5 + $0x10] sm:$0xff] (!%p296_p10)   ;;  %v1613_v36 = vld [vmem:[%s2194_s5 + $0x8] sm:$0xff] (!%p296_p10)  }
  0x1a   : > { %1445 = vmatprep.subr.bf16.mxu0 (!%p296_p10), %v1761_v9  ;;  %1453 = vmatprep.subr.bf16.mxu1 (!%p296_p10), %v1761_v9  ;;  %v1302_v16 = vld [vmem:[%s2209_s1] ss:$0 sm:$0xff] (!%p296_p10)  ;;  %v1614_v37 = vld [vmem:[%s2194_s5 + $0x18] sm:$0xff] (!%p296_p10)   ;;  %v1616_v39 = vld [vmem:[%s2194_s5 + $0x30] sm:$0xff] (!%p296_p10)  }
  0x1b   : > { %s342_s19 = scalar_select %p341_p11, %s1751_s30, 1  ;;  %v1615_v38 = vld [vmem:[%s2194_s5 + $0x20] sm:$0xff]   ;;  %v1617_v40 = vld [vmem:[%s2194_s5 + $0x28] sm:$0xff]   ;;  %v1618_v41 = vld [vmem:[%s2194_s5 + $0x38] sm:$0xff]  }
  0x1d   : > { %s1301_s20 = sshll.u32 %s342_s19, 3  ;;  %s1124_s19 = sshll.u32 %s326_s16, 4  ;;  %s2043_s19 = int_to_ptr.vmem [resolvable:$true] %s1124_s19 }
  0x1e   : > { %s347_s23 = scalar_lea.vmem %s2208_s0, %s1301_s20  ;;  %s2041_s20 = sshll.u32 %s1751_s30, 6 }
  0x1f   : > { %v349_v0 = vld [vmem:[%s347_s23] sm:$0xff]  ;;  %s2049_s23 = scalar_lea.hbm %s2195_s6, %s2041_s20  ;;  %s2055_s30 = scalar_lea.sflag [#allocation3], %s324_s26 }
  0x20   : > { %v353_v1 = vsel %vm352_vm0, %v349_v0, 0.0  ;;  %s1621_s24 = scalar_lea.vmem %s2043_s19, 256  ;;  %p1628_p1 = scmp.lt.s32.totalorder %s2043_s19, %s1626_s21 }
  0x21   : > { %354 = vadd.xlane.f32.xlu0 %v353_v1  ;;  %p1622_p12 = scmp.ne.s32.totalorder %s2043_s19, %s1621_s24  ;;  %p1629_p2 = scmp.lt.s32.totalorder %s1627_s22, %s1621_s24 }
  0x23   : > { %p1623_p13 = pnand %p1622_p12, %p1856_p4  ;;  %p1630_p3 = por %p1629_p2, %p1628_p1 }
  0x25   : > { %p1624_p0 = pneg %p1623_p13 }
  0x27   : > { %p1631_p5 = pnand %p1630_p3, %p1624_p0 }
  0xae   : > { %v355_v2 = vpop.xlane.xlu0 %354 }
  0xaf   : > { %v357_v3 = vmul.f32 0.03125, %v355_v2 }
  0xb1   : > { %v358_v4 = vsub.f32 %v349_v0, %v357_v3 }
  0xb3   : > { %v359_v5 = vmul.f32 %v358_v4, %v358_v4 }
  0xb5   : > { %v360_v6 = vsel %vm352_vm0, %v359_v5, 0.0 }
  0xb6   : > { %361 = vadd.xlane.f32.xlu0 %v360_v6 }
 0x143   : > { %v362_v12 = vpop.xlane.xlu0 %361 }
 0x144   : > { %v363_v13 = vmul.f32 0.03125, %v362_v12 }
 0x146   : > { %v364_v14 = vadd.f32 1e-05, %v363_v13 }
 0x148   : > { %1619 = vrsqrt.f32 %v364_v14 }
 0x152   : > { %v1620_v15 = vpop.eup %1619 }
 0x153   : > { %v366_v17 = vmul.f32 %v1620_v15, %v358_v4 }
 0x155   : > { %v373_v19 = vmul.f32 %v1302_v16, %v366_v17 }
 0x157   : > { %v380_v20 = vadd.f32 %v1303_v18, %v373_v19 }
 0x159   : > { %v1914_v23 = vpack.c.bf16 %v380_v20, %v380_v20 }
 0x15b   : > { %1434 = vmatmul.mubr.msk.bf16.vlgmr.msra.gmra.mrb[0].mxu0 %vm352_vm0, %v1914_v23  ;;  %1442 = vmatmul.mubr.msk.bf16.vlgmr.msra.gmra.mrb[0].mxu1 %vm352_vm0, %v1914_v23 }
 0x15c   : > { %1446 = vmatpush3.bf16.msra.mxu0 %v1599_v21  ;;  %1454 = vmatpush3.bf16.msra.mxu1 %v1600_v22 }
 0x15d   : > { %1447 = vmatprep.subr.bf16.mxu0 %v1761_v9  ;;  %1455 = vmatprep.subr.bf16.mxu1 %v1761_v9 }
 0x15e   : > { %1449 = vmatprep.mubr.msk.bf16.mxu0 %vm1762_vm1, %v1761_v9  ;;  %1457 = vmatprep.mubr.msk.bf16.mxu1 %vm1762_vm1, %v1761_v9 }
 0x160   : > { %1448 = vmatpush3.bf16.msra.mxu0 %v1601_v24  ;;  %1456 = vmatpush3.bf16.msra.mxu1 %v1602_v25 }
 0x161   : > { %1461 = vmatprep.subr.bf16.mxu0 %v1761_v9  ;;  %1469 = vmatprep.subr.bf16.mxu1 %v1761_v9 }
 0x163   : > { %1450 = vmatmul.mubr.msk.bf16.vlgmr.msra.gmra.mrb[4].mxu0 %vm352_vm0, %v1914_v23  ;;  %1458 = vmatmul.mubr.msk.bf16.vlgmr.msra.gmra.mrb[4].mxu1 %vm352_vm0, %v1914_v23 }
 0x164   : > { %1462 = vmatpush3.bf16.msra.mxu0 %v1603_v26  ;;  %1470 = vmatpush3.bf16.msra.mxu1 %v1604_v27 }
 0x165   : > { %1463 = vmatprep.subr.bf16.mxu0 %v1761_v9  ;;  %1471 = vmatprep.subr.bf16.mxu1 %v1761_v9 }
 0x166   : > { %1465 = vmatprep.mubr.msk.bf16.mxu0 %vm1762_vm1, %v1761_v9  ;;  %1473 = vmatprep.mubr.msk.bf16.mxu1 %vm1762_vm1, %v1761_v9 }
 0x168   : > { %1464 = vmatpush3.bf16.msra.mxu0 %v1605_v28  ;;  %1472 = vmatpush3.bf16.msra.mxu1 %v1606_v29 }
 0x169   : > { %1477 = vmatprep.subr.bf16.mxu0 %v1761_v9  ;;  %1485 = vmatprep.subr.bf16.mxu1 %v1761_v9 }
 0x16b   : > { %1466 = vmatmul.mubr.msk.bf16.vlgmr.msra.gmra.mrb[8].mxu0 %vm352_vm0, %v1914_v23  ;;  %1474 = vmatmul.mubr.msk.bf16.vlgmr.msra.gmra.mrb[8].mxu1 %vm352_vm0, %v1914_v23 }
 0x16c   : > { %1478 = vmatpush3.bf16.msra.mxu0 %v1607_v30  ;;  %1486 = vmatpush3.bf16.msra.mxu1 %v1608_v31 }
 0x16d   : > { %1479 = vmatprep.subr.bf16.mxu0 %v1761_v9  ;;  %1487 = vmatprep.subr.bf16.mxu1 %v1761_v9 }
 0x16e   : > { %1481 = vmatprep.mubr.msk.bf16.mxu0 %vm1762_vm1, %v1761_v9  ;;  %1489 = vmatprep.mubr.msk.bf16.mxu1 %vm1762_vm1, %v1761_v9 }
 0x170   : > { %1480 = vmatpush3.bf16.msra.mxu0 %v1609_v32  ;;  %1488 = vmatpush3.bf16.msra.mxu1 %v1610_v33 }
 0x171   : > { %1493 = vmatprep.subr.bf16.mxu0 %v1761_v9  ;;  %1501 = vmatprep.subr.bf16.mxu1 %v1761_v9 }
 0x173   : > { %1482 = vmatmul.mubr.msk.bf16.vlgmr.msra.gmra.mrb[12].mxu0 %vm352_vm0, %v1914_v23  ;;  %1490 = vmatmul.mubr.msk.bf16.vlgmr.msra.gmra.mrb[12].mxu1 %vm352_vm0, %v1914_v23 }
 0x174   : > { %1494 = vmatpush3.bf16.msra.mxu0 %v1611_v34  ;;  %1502 = vmatpush3.bf16.msra.mxu1 %v1612_v35 }
 0x175   : > { %1495 = vmatprep.subr.bf16.mxu0 %v1761_v9  ;;  %1503 = vmatprep.subr.bf16.mxu1 %v1761_v9 }
 0x176   : > { %1497 = vmatprep.mubr.msk.bf16.mxu0 %vm1762_vm1, %v1761_v9  ;;  %1505 = vmatprep.mubr.msk.bf16.mxu1 %vm1762_vm1, %v1761_v9 }
 0x178   : > { %1496 = vmatpush3.bf16.msra.mxu0 %v1613_v36  ;;  %1504 = vmatpush3.bf16.msra.mxu1 %v1614_v37 }
 0x179   : > { %1509 = vmatprep.subr.bf16.mxu0 %v1761_v9  ;;  %1517 = vmatprep.subr.bf16.mxu1 %v1761_v9 }
 0x17b   : > { %1498 = vmatmul.mubr.msk.bf16.vlgmr.msra.gmra.mrb[16].mxu0 %vm352_vm0, %v1914_v23  ;;  %1506 = vmatmul.mubr.msk.bf16.vlgmr.msra.gmra.mrb[16].mxu1 %vm352_vm0, %v1914_v23 }
 0x17c   : > { %1510 = vmatpush3.bf16.msra.mxu0 %v1615_v38  ;;  %1518 = vmatpush3.bf16.msra.mxu1 %v1616_v39 }
 0x17d   : > { %1511 = vmatprep.subr.bf16.mxu0 %v1761_v9  ;;  %1519 = vmatprep.subr.bf16.mxu1 %v1761_v9 }
 0x17e   : > { %1513 = vmatprep.mubr.msk.bf16.mxu0 %vm1762_vm1, %v1761_v9  ;;  %1521 = vmatprep.mubr.msk.bf16.mxu1 %vm1762_vm1, %v1761_v9 }
 0x180   : > { %1512 = vmatpush3.bf16.msra.mxu0 %v1617_v40  ;;  %1520 = vmatpush3.bf16.msra.mxu1 %v1618_v41 }
 0x183   : > { %1514 = vmatmul.mubr.msk.bf16.vlgmr.msra.gmra.mrb[20].mxu0 %vm352_vm0, %v1914_v23  ;;  %1522 = vmatmul.mubr.msk.bf16.vlgmr.msra.gmra.mrb[20].mxu1 %vm352_vm0, %v1914_v23 }
 0x22e   : > { %v435_v42 = vpop.f32.mrb[0].mxu0  ;;  %v495_v43 = vpop.f32.mrb[0].mxu1 }
 0x22f   : > { %v441_v44 = vpack.c.bf16 %v435_v42, %v435_v42  ;;  %v501_v45 = vpack.c.bf16 %v495_v43, %v495_v43  ;;  %v1435_v46 = vpop.f32.mrb[1].mxu0  ;;  %v1443_v47 = vpop.f32.mrb[1].mxu1 }
 0x230   : > { %v438_v48 = vpop.f32.mrb[2].mxu0  ;;  %v498_v49 = vpop.f32.mrb[2].mxu1 }
 0x231   : > { %443 = vst.msk [vmem:[%s326_s16] sm:$0xf] %vm442_vm2, %v441_v44  ;;  %1314 = vst.msk [vmem:[%s326_s16 + $0x4] sm:$0xf] %vm442_vm2, %v501_v45  ;;  %v1436_v50 = vpop.f32.mrb[3].mxu0  ;;  %v1444_v51 = vpop.f32.mrb[3].mxu1 }
 0x236   : > { %v555_v52 = vpop.f32.mrb[4].mxu0  ;;  %v615_v53 = vpop.f32.mrb[4].mxu1 }
 0x237   : > { %v561_v54 = vpack.c.bf16 %v555_v52, %v555_v52  ;;  %v621_v55 = vpack.c.bf16 %v615_v53, %v615_v53  ;;  %v1451_v56 = vpop.f32.mrb[5].mxu0  ;;  %v1459_v57 = vpop.f32.mrb[5].mxu1 }
 0x238   : > { %v558_v58 = vpop.f32.mrb[6].mxu0  ;;  %v618_v59 = vpop.f32.mrb[6].mxu1 }
 0x239   : > { %1322 = vst.msk [vmem:[%s326_s16 + $0x8] sm:$0xf] %vm442_vm2, %v561_v54  ;;  %1330 = vst.msk [vmem:[%s326_s16 + $0xc] sm:$0xf] %vm442_vm2, %v621_v55  ;;  %v1452_v60 = vpop.f32.mrb[7].mxu0  ;;  %v1460_v61 = vpop.f32.mrb[7].mxu1 }
 0x23a   : > { %1634 = shalt.err (!%p1631_p5)
}
 0x23b   : > { %s1635_s26 = scalar_lea.hbm %s2049_s23, 256  ;;  %s1639_s25 = scalar_lea.hbm %s2195_s6, 512 }
 0x23c   : > { %p1636_p6 = scmp.ne.s32.totalorder %s2049_s23, %s1635_s26  ;;  %p1640_p10 = scmp.lt.u32.totalorder %s2049_s23, %s2195_s6 }
 0x23d   : > { %p1641_p11 = scmp.lt.u32.totalorder %s1639_s25, %s1635_s26  ;;  %p1643_p13 = scmp.lt.u32.totalorder %s1635_s26, %s2049_s23 }
 0x23e   : > { %p1637_p7 = pnand %p1636_p6, %p1856_p4 }
 0x23f   : > { %p1642_p12 = por %p1641_p11, %p1640_p10 }
 0x240   : > { %p1638_p9 = pneg %p1637_p7 }
 0x241   : > { %p1644_p0 = por %p1643_p13, %p1642_p12 }
 0x243   : > { %p1645_p1 = pnand %p1644_p0, %p1638_p9 }
 0x245   : > { %1648 = shalt.err (!%p1645_p1)
}
 0x246   : > { %s2200_s24 = smov 64   ;;  %s2202_s22 = smov 128   ;;  %v674_v62 = vpop.f32.mrb[8].mxu0  ;;  %v733_v63 = vpop.f32.mrb[8].mxu1 }
 0x247   : > { %s1766_s0 = smov 4   ;;  %v680_v0 = vpack.c.bf16 %v674_v62, %v674_v62  ;;  %v739_v1 = vpack.c.bf16 %v733_v63, %v733_v63  ;;  %v1467_v2 = vpop.f32.mrb[9].mxu0  ;;  %v1475_v3 = vpop.f32.mrb[9].mxu1  ;;  %s333_s11 = scalar_lea.vmem [#allocation4], %s2035_s14 }
 0x248   : > { %1525 = dma.vmem_to_hbm [thread:$0]  (%p1856_p4), %s2043_s19, 256, %s2049_s23, %s2055_s30, %s2200_s24, %s2202_s22, %s1766_s0   ;;  %v677_v4 = vpop.f32.mrb[10].mxu0  ;;  %v736_v5 = vpop.f32.mrb[10].mxu1 }
 0x249   : > { %681 = vst.msk [vmem:[%s333_s11] sm:$0xf] %vm442_vm2, %v680_v0  ;;  %1341 = vst.msk [vmem:[%s333_s11 + $0x4] sm:$0xf] %vm442_vm2, %v739_v1  ;;  %v1468_v6 = vpop.f32.mrb[11].mxu0  ;;  %v1476_v7 = vpop.f32.mrb[11].mxu1  ;;  %s2095_s30 = scalar_lea.hbm %s2196_s7, %s2041_s20 }
 0x24a   : > { %s1140_s12 = sshll.u32 %s333_s11, 4  ;;  %s2210_s26 = sadd.s32 4294967295, %s1759_s10   ;;  %v793_v8 = vpop.f32.mrb[12].mxu0  ;;  %v853_v9 = vpop.f32.mrb[12].mxu1  ;;  %s2089_s12 = int_to_ptr.vmem [resolvable:$true] %s1140_s12 }
 0x24b   : > { %s2087_s16 = sand.u32 1, %s2210_s26   ;;  %v799_v10 = vpack.c.bf16 %v793_v8, %v793_v8  ;;  %v859_v11 = vpack.c.bf16 %v853_v9, %v853_v9  ;;  %v1483_v12 = vpop.f32.mrb[13].mxu0  ;;  %v1491_v13 = vpop.f32.mrb[13].mxu1  ;;  %s1649_s21 = scalar_lea.vmem %s2089_s12, 256 }
 0x24c   : > { %v796_v14 = vpop.f32.mrb[14].mxu0  ;;  %v856_v15 = vpop.f32.mrb[14].mxu1  ;;  %p1650_p2 = scmp.ne.s32.totalorder %s2089_s12, %s1649_s21  ;;  %s1767_s26 = smov [#allocation4]  }
 0x24d   : > { %1349 = vst.msk [vmem:[%s333_s11 + $0x8] sm:$0xf] %vm442_vm2, %v799_v10  ;;  %1357 = vst.msk [vmem:[%s333_s11 + $0xc] sm:$0xf] %vm442_vm2, %v859_v11  ;;  %v1484_v16 = vpop.f32.mrb[15].mxu0  ;;  %v1492_v17 = vpop.f32.mrb[15].mxu1 }
 0x24e   : > { %p1651_p3 = pnand %p1650_p2, %p1856_p4  ;;  %s1653_s24 = sshll.u32 %s1767_s26, 4  ;;  %s1654_s24 = int_to_ptr.vmem [resolvable:$false] %s1653_s24 }
 0x24f   : > { %s1655_s19 = scalar_lea.vmem %s1654_s24, 512  ;;  %p1656_p6 = scmp.lt.s32.totalorder %s2089_s12, %s1654_s24 }
 0x250   : > { %p1652_p5 = pneg %p1651_p3  ;;  %p1657_p7 = scmp.lt.s32.totalorder %s1655_s19, %s1649_s21 }
 0x252   : > { %p1658_p9 = por %p1657_p7, %p1656_p6 }
 0x254   : > { %p1659_p10 = pnand %p1658_p9, %p1652_p5 }
 0x256   : > { %1662 = shalt.err (!%p1659_p10)
}
 0x257   : > { %s1663_s11 = scalar_lea.hbm %s2095_s30, 256  ;;  %s1667_s26 = scalar_lea.hbm %s2196_s7, 512 }
 0x258   : > { %p1664_p11 = scmp.ne.s32.totalorder %s2095_s30, %s1663_s11  ;;  %p1668_p0 = scmp.lt.u32.totalorder %s2095_s30, %s2196_s7 }
 0x259   : > { %p1669_p1 = scmp.lt.u32.totalorder %s1667_s26, %s1663_s11  ;;  %p1671_p3 = scmp.lt.u32.totalorder %s1663_s11, %s2095_s30 }
 0x25a   : > { %p1665_p12 = pnand %p1664_p11, %p1856_p4 }
 0x25b   : > { %p1670_p2 = por %p1669_p1, %p1668_p0 }
 0x25c   : > { %p1666_p13 = pneg %p1665_p12 }
 0x25d   : > { %p1672_p5 = por %p1671_p3, %p1670_p2 }
 0x25f   : > { %p1673_p6 = pnand %p1672_p5, %p1666_p13 }
 0x261   : > { %1676 = shalt.err (!%p1673_p6)
}
 0x262   : > { %s2211_s21 = smov 128   ;;  %s2212_s19 = smov 64   ;;  %v912_v18 = vpop.f32.mrb[16].mxu0  ;;  %v971_v19 = vpop.f32.mrb[16].mxu1 }
 0x263   : > { %s2213_s1 = scalar_lea.sflag [#allocation5], %s2087_s16  ;;  %v918_v20 = vpack.c.bf16 %v912_v18, %v912_v18  ;;  %v977_v21 = vpack.c.bf16 %v971_v19, %v971_v19  ;;  %v1499_v22 = vpop.f32.mrb[17].mxu0  ;;  %v1507_v23 = vpop.f32.mrb[17].mxu1  ;;  %s340_s22 = scalar_lea.vmem [#allocation6], %s2035_s14 }
 0x264   : > { %1526 = dma.vmem_to_hbm [thread:$0]  (%p1856_p4), %s2089_s12, 256, %s2095_s30, %s2213_s1, %s2212_s19, %s2211_s21, %s1766_s0   ;;  %v915_v24 = vpop.f32.mrb[18].mxu0  ;;  %v974_v25 = vpop.f32.mrb[18].mxu1 }
 0x265   : > { %919 = vst.msk [vmem:[%s340_s22] sm:$0xf] %vm442_vm2, %v918_v20  ;;  %1368 = vst.msk [vmem:[%s340_s22 + $0x4] sm:$0xf] %vm442_vm2, %v977_v21  ;;  %v1500_v26 = vpop.f32.mrb[19].mxu0  ;;  %v1508_v27 = vpop.f32.mrb[19].mxu1  ;;  %s2135_s12 = scalar_lea.hbm %s2197_s8, %s2041_s20 }
 0x266   : > { %s1156_s25 = sshll.u32 %s340_s22, 4  ;;  %v1031_v28 = vpop.f32.mrb[20].mxu0  ;;  %v1091_v29 = vpop.f32.mrb[20].mxu1  ;;  %s1768_s11 = smov [#allocation6]   ;;  %s2129_s25 = int_to_ptr.vmem [resolvable:$true] %s1156_s25 }
 0x267   : > { %v1037_v30 = vpack.c.bf16 %v1031_v28, %v1031_v28  ;;  %v1097_v31 = vpack.c.bf16 %v1091_v29, %v1091_v29  ;;  %v1515_v32 = vpop.f32.mrb[21].mxu0  ;;  %v1523_v33 = vpop.f32.mrb[21].mxu1  ;;  %s1677_s30 = scalar_lea.vmem %s2129_s25, 256  ;;  %s1681_s23 = sshll.u32 %s1768_s11, 4  ;;  %s1682_s23 = int_to_ptr.vmem [resolvable:$false] %s1681_s23 }
 0x268   : > { %v1034_v34 = vpop.f32.mrb[22].mxu0  ;;  %v1094_v35 = vpop.f32.mrb[22].mxu1  ;;  %p1678_p7 = scmp.ne.s32.totalorder %s2129_s25, %s1677_s30  ;;  %s1683_s26 = scalar_lea.vmem %s1682_s23, 512 }
 0x269   : > { %1376 = vst.msk [vmem:[%s340_s22 + $0x8] sm:$0xf] %vm442_vm2, %v1037_v30  ;;  %1384 = vst.msk [vmem:[%s340_s22 + $0xc] sm:$0xf] %vm442_vm2, %v1097_v31  ;;  %v1516_v36 = vpop.f32.mrb[23].mxu0  ;;  %v1524_v37 = vpop.f32.mrb[23].mxu1  ;;  %p1684_p11 = scmp.lt.s32.totalorder %s2129_s25, %s1682_s23  ;;  %p1685_p12 = scmp.lt.s32.totalorder %s1683_s26, %s1677_s30 }
 0x26a   : > { %p1679_p9 = pnand %p1678_p7, %p1856_p4 }
 0x26b   : > { %p1686_p13 = por %p1685_p12, %p1684_p11 }
 0x26c   : > { %p1680_p10 = pneg %p1679_p9 }
 0x26e   : > { %p1687_p0 = pnand %p1686_p13, %p1680_p10 }
 0x270   : > { %1690 = shalt.err (!%p1687_p0)
}
 0x271   : > { %s1691_s20 = scalar_lea.hbm %s2135_s12, 256  ;;  %s1695_s1 = scalar_lea.hbm %s2197_s8, 512 }
 0x272   : > { %p1692_p1 = scmp.ne.s32.totalorder %s2135_s12, %s1691_s20  ;;  %p1696_p5 = scmp.lt.u32.totalorder %s2135_s12, %s2197_s8 }
 0x273   : > { %p1697_p6 = scmp.lt.u32.totalorder %s1695_s1, %s1691_s20  ;;  %p1699_p9 = scmp.lt.u32.totalorder %s1691_s20, %s2135_s12 }
 0x274   : > { %p1693_p2 = pnand %p1692_p1, %p1856_p4 }
 0x275   : > { %p1698_p7 = por %p1697_p6, %p1696_p5 }
 0x276   : > { %p1694_p3 = pneg %p1693_p2 }
 0x277   : > { %p1700_p10 = por %p1699_p9, %p1698_p7 }
 0x279   : > { %p1701_p11 = pnand %p1700_p10, %p1694_p3 }
 0x27b   : > { %1704 = shalt.err (!%p1701_p11)
}
 0x27c   : > { %s2214_s30 = scalar_lea.sflag [#allocation5], %s2087_s16 }
 0x27d   : > { %1527 = dma.vmem_to_hbm [thread:$0]  (%p1856_p4), %s2129_s25, 256, %s2135_s12, %s2214_s30, %s2212_s19, %s2211_s21, %s1766_s0  }
 0x27e PF: > { %p1541_p12 = scmp.ge.s32.totalorder %s1759_s10, 2  ;;  %s1171_s23 = sand.u32 1, %s1739_s27  }
 0x27f   : > { %s1172_s26 = scalar_lea.sflag [#allocation3], %s1171_s23 }
 0x280   : > { %p1532_p13 = pnand %p1541_p12, %p1865_p8 }
 0x282   : > { %1730 = dma.done.wait (!%p1532_p13), %s1172_s26, 256  }
 0x283   : > { %1732 = vsyncadd (!%p1532_p13), %s1172_s26, 4294967040  ;;  %s2215_s15 = sadd.s32 4294967294, %s1759_s10  }
 0x284   : > { %s1180_s20 = sand.u32 1, %s2215_s15  }
 0x285   : > { %s1181_s24 = scalar_lea.sflag [#allocation5], %s1180_s20 }
 0x286   : > { %1734 = dma.done.wait (!%p1532_p13), %s1181_s24, 512  }
 0x287   : > { %1736 = vsyncadd (!%p1532_p13), %s1181_s24, 4294966784  ;;  %s25_s10 = sadd.s32 1, %s1759_s10   ;;  %s2216_s27 = smov %s1743_s28 }
 0x288   : > { %p22_p4 = scmp.ge.s32.totalorder %s25_s10, 4   ;;  %s2217_s28 = smov %s1747_s29 }
 0x289   : > { %s2218_s29 = smov %s1871_s18  ;;  %s2219_s30 = smov %s1755_s9 }
 0x28a   : > { %s2220_s9 = smov %s2222_s13  ;;  %24 = sbr.rel (!%p22_p4) target bundleno = 9 (0x9), region = 129 }
 0x291   :  { %1195 = vsyncpa [#allocation3], 1 }
 0x292   :  { %1197 = vsyncpa [#allocation3 + $0x1], 1 }
 0x293   :  { %1198 = vsyncpa [#allocation5], 1 }
 0x294   :  { %1200 = vsyncpa [#allocation5 + $0x1], 1 }

</bundles_post_ra>
